<compile_context>
chip_gen: v7x
topology: tpu7x:2x2x1
jax: 0.10.0
libtpu: 0.0.40
codegen_flags: <defaults>
</compile_context>

<pallas_src>
import jax
import jax.numpy as jnp
from jax.experimental import pallas as pl
from jax.experimental.pallas import tpu as pltpu


def _round_up(x, m):
    return ((x + m - 1) // m) * m


def _cdiv(a, b):
    return -(-a // b)


def _largest_aligned_divisor(total, limit, align):
    """Largest t <= limit with total % t == 0 and t % align == 0 (total % align == 0)."""
    units = total // align
    for d in range(1, units + 1):
        if units % d == 0 and (units // d) * align <= limit:
            return (units // d) * align
    return align


# ---------------------------------------------------------------------------
# Kernel: MXU matmul tile + fused (folded bias/BN scale-shift + PReLU) epilogue.
# Grid = (M, N, K); K is innermost with an f32 accumulator; the epilogue runs
# only on the final K step so the hot loop is pure MXU.
# ---------------------------------------------------------------------------
def _modality_decomposition_kernel(x_ref, w_ref, scale_ref, shift_ref, alpha_ref,
                                   o_ref, acc_ref):
    k = pl.program_id(2)

    @pl.when(k == 0)
    def _():
        acc_ref[...] = jnp.zeros_like(acc_ref)

    # Cast x to the compute dtype *inside* the kernel (no host-side cast pass).
    acc_ref[...] += jnp.dot(x_ref[...].astype(w_ref.dtype), w_ref[...],
                            preferred_element_type=jnp.float32)

    @pl.when(k == pl.num_programs(2) - 1)
    def _():
        y = acc_ref[...] * scale_ref[...] + shift_ref[...]   # folded bias + BN (eval)
        y = jnp.where(y >= 0.0, y, alpha_ref[...] * y)       # PReLU
        o_ref[...] = y.astype(o_ref.dtype)


# ---------------------------------------------------------------------------
# One-time parameter preparation (fold + cast).  Call once, reuse per forward.
# ---------------------------------------------------------------------------
def prepare_params(w, b, gamma, beta, running_mean, running_var, alpha, *,
                   eps=1e-5, compute_dtype=jnp.bfloat16):
    """w: (in_dim, out_dim) stored as (in_features, out_features)."""
    in_dim, out_dim = w.shape
    inv_std = jax.lax.rsqrt(running_var.astype(jnp.float32) + jnp.float32(eps))
    scale = gamma.astype(jnp.float32) * inv_std
    shift = (b.astype(jnp.float32) - running_mean.astype(jnp.float32)) * scale \
        + beta.astype(jnp.float32)
    alpha_v = jnp.broadcast_to(jnp.asarray(alpha, jnp.float32).reshape(-1), (out_dim,))
    return dict(w=w.astype(compute_dtype),
                scale=scale.reshape(1, out_dim),
                shift=shift.reshape(1, out_dim),
                alpha=alpha_v.reshape(1, out_dim))


# ---------------------------------------------------------------------------
# Tile / VMEM-limit selection (generation aware).
# ---------------------------------------------------------------------------
def _vmem_capacity():
    try:
        return int(pltpu.get_tpu_info().vmem_capacity_bytes)
    except Exception:
        return 64 << 20                      # conservative (v7x per-core VMEM)


def _choose_tiles(B, K, N, x_bytes, w_bytes, out_bytes):
    vmem_cap = _vmem_capacity()
    small_vmem = vmem_cap <= (64 << 20)      # v7x-class: 64 MiB VMEM, 2 TCs
    budget = (vmem_cap * 7) // 10            # headroom for compiler scratch

    tm_target = 256 if small_vmem else 512   # big row tiles are free on 128 MiB parts
    tm = B if B <= tm_target else tm_target  # full-dim block or multiple of 8
    tn = N
    tk = K

    def footprint(tm_, tn_, tk_):
        n_steps, k_steps = _cdiv(N, tn_), _cdiv(K, tk_)
        w_bufs = 1 if (n_steps == 1 and k_steps == 1) else 2
        p_bufs = 1 if n_steps == 1 else 2
        return (2 * tm_ * tk_ * x_bytes          # x tile, double-buffered
                + w_bufs * tk_ * tn_ * w_bytes   # weight tile
                + p_bufs * 3 * tn_ * 4           # scale / shift / alpha (f32)
                + 2 * tm_ * tn_ * out_bytes      # output tile, double-buffered
                + tm_ * tn_ * 4)                 # f32 accumulator scratch

    # Shrink N, then K, then M until the working set fits VMEM.
    while footprint(tm, tn, tk) > budget and N % 128 == 0 and tn > 128:
        tn = max(128, _round_up(tn // 2, 128))
    while footprint(tm, tn, tk) > budget and K % 128 == 0 and tk > 512:
        tk = _largest_aligned_divisor(K, max(512, tk // 2), 128)   # exact reduction edge
    while footprint(tm, tn, tk) > budget and tm > 8:
        tm = max(8, _round_up(tm // 2, 8))

    # Dual-TensorCore parts: make sure >= 2 "parallel" programs exist.
    if small_vmem and _cdiv(B, tm) * _cdiv(N, tn) < 2:
        if B >= 16:
            tm = _round_up(_cdiv(B, 2), 8)
        elif N % 128 == 0 and N >= 256:
            tn = _round_up(_cdiv(N, 2), 128)
    if tm > B:
        tm = B                              # keep blocks legal for tiny batches

    need = footprint(tm, tn, tk)
    vmem_limit = int(min(max(32 << 20, need + (8 << 20)), (vmem_cap * 9) // 10))
    return tm, tn, tk, vmem_limit


# ---------------------------------------------------------------------------
# Forward pass.
# ---------------------------------------------------------------------------
def modality_decomposition(x, params, *, out_dtype=None, use_pallas=None):
    """x: (B, in_dim); params from prepare_params. Returns (B, in_dim)."""
    B, K = x.shape
    Kw, N = params["w"].shape
    assert K == Kw, f"in_dim mismatch: x has {K}, weight has {Kw}"
    out_dtype = x.dtype if out_dtype is None else out_dtype

    if use_pallas is None:
        # Tiny problems: pallas_call fixed cost dominates; let XLA fuse instead.
        use_pallas = (B >= 8) and (B * N >= (1 << 16))
    if not use_pallas:
        z = jnp.dot(x.astype(params["w"].dtype), params["w"],
                    preferred_element_type=jnp.float32)
        y = z * params["scale"] + params["shift"]
        return jnp.where(y >= 0.0, y, params["alpha"] * y).astype(out_dtype)

    x_bytes = x.dtype.itemsize
    w_bytes = params["w"].dtype.itemsize
    out_bytes = jnp.dtype(out_dtype).itemsize
    tm, tn, tk, vmem_limit = _choose_tiles(B, K, N, x_bytes, w_bytes, out_bytes)
    m_steps, n_steps, k_steps = _cdiv(B, tm), _cdiv(N, tn), _cdiv(K, tk)

    # Single-buffer operands that never change across the grid.
    w_kw = dict(pipeline_mode=pl.Buffered(1)) if (n_steps == 1 and k_steps == 1) else {}
    p_kw = dict(pipeline_mode=pl.Buffered(1)) if n_steps == 1 else {}

    return pl.pallas_call(
        _modality_decomposition_kernel,
        out_shape=jax.ShapeDtypeStruct((B, N), out_dtype),
        grid=(m_steps, n_steps, k_steps),
        in_specs=[
            pl.BlockSpec((tm, tk), lambda i, j, k: (i, k)),           # x (native dtype)
            pl.BlockSpec((tk, tn), lambda i, j, k: (k, j), **w_kw),   # W (bf16)
            pl.BlockSpec((1, tn), lambda i, j, k: (0, j), **p_kw),    # scale
            pl.BlockSpec((1, tn), lambda i, j, k: (0, j), **p_kw),    # shift
            pl.BlockSpec((1, tn), lambda i, j, k: (0, j), **p_kw),    # prelu alpha
        ],
        out_specs=pl.BlockSpec((tm, tn), lambda i, j, k: (i, j)),
        scratch_shapes=[pltpu.VMEM((tm, tn), jnp.float32)],
        compiler_params=pltpu.CompilerParams(
            dimension_semantics=("parallel", "parallel", "arbitrary"),
            vmem_limit_bytes=vmem_limit,
        ),
    )(x, params["w"], params["scale"], params["shift"], params["alpha"])


# ---------------------------------------------------------------------------
# Test utilities.
# ---------------------------------------------------------------------------
def init_params(key, in_dim, dtype=jnp.float32):
    """PyTorch-style init, plus non-trivial BN running stats."""
    k1, k2, k3, k4, k5, k6 = jax.random.split(key, 6)
    bound = 1.0 / (in_dim ** 0.5)
    w = jax.random.uniform(k1, (in_dim, in_dim), dtype, -bound, bound)   # (in, out)
    b = jax.random.uniform(k2, (in_dim,), dtype, -bound, bound)
    gamma = jax.random.uniform(k3, (in_dim,), dtype, 0.9, 1.1)
    beta = 0.1 * jax.random.normal(k4, (in_dim,), dtype)
    running_mean = 0.1 * jax.random.normal(k5, (in_dim,), dtype)
    running_var = jax.random.uniform(k6, (in_dim,), dtype, 0.5, 1.5)
    alpha = jnp.float32(0.25)                                            # nn.PReLU() default
    return w, b, gamma, beta, running_mean, running_var, alpha


def reference(x, w, b, gamma, beta, running_mean, running_var, alpha, eps=1e-5):
    z = x @ w + b
    y = (z - running_mean) / jnp.sqrt(running_var + eps) * gamma + beta
    return jnp.where(y >= 0.0, y, alpha * y)


if __name__ == "__main__":
    key = jax.random.PRNGKey(0)

    def run_case(batch, in_dim, tol=5e-2):
        kx, kp = jax.random.split(jax.random.fold_in(key, 1000 * in_dim + batch))
        x = jax.random.normal(kx, (batch, in_dim), jnp.float32)
        w, b, gamma, beta, rm, rv, alpha = init_params(kp, in_dim)
        params = prepare_params(w, b, gamma, beta, rm, rv, alpha)
        out = modality_decomposition(x, params, use_pallas=True)
        out = jax.block_until_ready(out)
        ref = reference(x, w, b, gamma, beta, rm, rv, alpha)
        assert out.shape == ref.shape, (out.shape, ref.shape)
        err = float(jnp.max(jnp.abs(out.astype(jnp.float32) - ref)))
        denom = max(1.0, float(jnp.max(jnp.abs(ref))))
        assert err <= tol * denom, \
            f"mismatch (B={batch}, in_dim={in_dim}): max abs err {err}, ref scale {denom}"

    run_case(16, 64)     # small, full-dim blocks
    run_case(64, 256)    # lane-aligned path
    run_case(20, 96)     # unaligned batch/features: masked edges, no padding copies
    print("KERNEL_OK")
</pallas_src>

<mosaic_0001>
module attributes {stable_mosaic.version = 11 : i64} {
  func.func @_modality_decomposition_kernel(%arg0: i32, %arg1: i32, %arg2: i32, %arg3: memref<8x64xf32, #tpu.memory_space<vmem>>, %arg4: memref<64x64xbf16, #tpu.memory_space<vmem>>, %arg5: memref<1x64xf32, #tpu.memory_space<vmem>>, %arg6: memref<1x64xf32, #tpu.memory_space<vmem>>, %arg7: memref<1x64xf32, #tpu.memory_space<vmem>>, %arg8: memref<8x64xf32, #tpu.memory_space<vmem>>, %arg9: memref<8x64xf32, #tpu.memory_space<vmem>>) attributes {dimension_semantics = [#tpu.dimension_semantics<parallel>, #tpu.dimension_semantics<parallel>, #tpu.dimension_semantics<arbitrary>], iteration_bounds = array<i64: 2, 1, 1>, scalar_prefetch = 0 : i64, scratch_operands = 1 : i64, tpu.core_type = #tpu.core_type<tc>, window_params = [{transform_indices = @transform_0, window_bounds = array<i64: 8, 64>}, {pipeline_mode = #tpu.pipeline_mode<synchronous>, transform_indices = @transform_1, window_bounds = array<i64: 64, 64>}, {pipeline_mode = #tpu.pipeline_mode<synchronous>, transform_indices = @transform_2, window_bounds = array<i64: 1, 64>}, {pipeline_mode = #tpu.pipeline_mode<synchronous>, transform_indices = @transform_3, window_bounds = array<i64: 1, 64>}, {pipeline_mode = #tpu.pipeline_mode<synchronous>, transform_indices = @transform_4, window_bounds = array<i64: 1, 64>}, {transform_indices = @transform_5, window_bounds = array<i64: 8, 64>}]} {
    %c0_i32 = arith.constant 0 : i32
    %0 = arith.cmpi eq, %arg2, %c0_i32 : i32
    %1 = arith.extui %0 : i1 to i32
    %c0_i32_0 = arith.constant 0 : i32
    %2 = arith.cmpi ne, %1, %c0_i32_0 : i32
    scf.if %2 {
      %cst_10 = arith.constant 0.000000e+00 : f32
      %13 = vector.broadcast %cst_10 : f32 to vector<8x64xf32>
      %c0_11 = arith.constant 0 : index
      %c0_12 = arith.constant 0 : index
      %14 = vector.load %arg9[%c0_11, %c0_12] : memref<8x64xf32, #tpu.memory_space<vmem>>, vector<8x64xf32>
      tpu.vector_store %arg9[%c0_11, %c0_12], %13 {strides = array<i32>} : memref<8x64xf32, #tpu.memory_space<vmem>>, vector<8x64xf32>,
    } else {
    }
    %c0 = arith.constant 0 : index
    %c0_1 = arith.constant 0 : index
    %3 = vector.load %arg9[%c0, %c0_1] : memref<8x64xf32, #tpu.memory_space<vmem>>, vector<8x64xf32>
    %c0_2 = arith.constant 0 : index
    %c0_3 = arith.constant 0 : index
    %4 = vector.load %arg3[%c0_2, %c0_3] : memref<8x64xf32, #tpu.memory_space<vmem>>, vector<8x64xf32>
    %5 = arith.truncf %4 : vector<8x64xf32> to vector<8x64xbf16>
    %c0_4 = arith.constant 0 : index
    %c0_5 = arith.constant 0 : index
    %6 = vector.load %arg4[%c0_4, %c0_5] : memref<64x64xbf16, #tpu.memory_space<vmem>>, vector<64x64xbf16>
    %cst = arith.constant dense<0.000000e+00> : vector<8x64xf32>
    %7 = tpu.matmul %5, %6, %cst {dimension_numbers = #tpu.dot_dimension_numbers<[1], [0], [0], [1], [0, 0, 1, 1], [], []>} : vector<8x64xbf16>, vector<64x64xbf16>, vector<8x64xf32> -> vector<8x64xf32>
    %8 = arith.addf %3, %7 : vector<8x64xf32>
    %c0_6 = arith.constant 0 : index
    %c0_7 = arith.constant 0 : index
    %9 = vector.load %arg9[%c0_6, %c0_7] : memref<8x64xf32, #tpu.memory_space<vmem>>, vector<8x64xf32>
    tpu.vector_store %arg9[%c0_6, %c0_7], %8 {strides = array<i32>} : memref<8x64xf32, #tpu.memory_space<vmem>>, vector<8x64xf32>,
    %c0_i32_8 = arith.constant 0 : i32
    %10 = arith.cmpi eq, %arg2, %c0_i32_8 : i32
    %11 = arith.extui %10 : i1 to i32
    %c0_i32_9 = arith.constant 0 : i32
    %12 = arith.cmpi ne, %11, %c0_i32_9 : i32
    scf.if %12 {
      %c0_10 = arith.constant 0 : index
      %c0_11 = arith.constant 0 : index
      %13 = vector.load %arg9[%c0_10, %c0_11] : memref<8x64xf32, #tpu.memory_space<vmem>>, vector<8x64xf32>
      %c0_12 = arith.constant 0 : index
      %c0_13 = arith.constant 0 : index
      %14 = vector.load %arg5[%c0_12, %c0_13] : memref<1x64xf32, #tpu.memory_space<vmem>>, vector<1x64xf32>
      %15 = vector.broadcast %14 : vector<1x64xf32> to vector<8x64xf32>
      %16 = arith.mulf %13, %15 : vector<8x64xf32>
      %c0_14 = arith.constant 0 : index
      %c0_15 = arith.constant 0 : index
      %17 = vector.load %arg6[%c0_14, %c0_15] : memref<1x64xf32, #tpu.memory_space<vmem>>, vector<1x64xf32>
      %18 = vector.broadcast %17 : vector<1x64xf32> to vector<8x64xf32>
      %19 = arith.addf %16, %18 : vector<8x64xf32>
      %cst_16 = arith.constant 0.000000e+00 : f32
      %20 = vector.broadcast %cst_16 : f32 to vector<8x64xf32>
      %21 = arith.cmpf oge, %19, %20 : vector<8x64xf32>
      %c0_17 = arith.constant 0 : index
      %c0_18 = arith.constant 0 : index
      %22 = vector.load %arg7[%c0_17, %c0_18] : memref<1x64xf32, #tpu.memory_space<vmem>>, vector<1x64xf32>
      %23 = vector.broadcast %22 : vector<1x64xf32> to vector<8x64xf32>
      %24 = arith.mulf %23, %19 : vector<8x64xf32>
      %25 = arith.select %21, %19, %24 : vector<8x64xi1>, vector<8x64xf32>
      %c0_19 = arith.constant 0 : index
      %c0_20 = arith.constant 0 : index
      %26 = vector.load %arg8[%c0_19, %c0_20] : memref<8x64xf32, #tpu.memory_space<vmem>>, vector<8x64xf32>
      tpu.vector_store %arg8[%c0_19, %c0_20], %25 {strides = array<i32>} : memref<8x64xf32, #tpu.memory_space<vmem>>, vector<8x64xf32>,
    } else {
    }
    return
  }
  func.func @transform_0(%arg0: i32, %arg1: i32, %arg2: i32) -> (i32, i32) {
    %c0_i32 = arith.constant 0 : i32
    return %arg0, %arg2 : i32, i32
  }
  func.func @transform_1(%arg0: i32, %arg1: i32, %arg2: i32) -> (i32, i32) {
    %c0_i32 = arith.constant 0 : i32
    return %arg2, %arg1 : i32, i32
  }
  func.func @transform_2(%arg0: i32, %arg1: i32, %arg2: i32) -> (i32, i32) {
    %c0_i32 = arith.constant 0 : i32
    %c0_i32_0 = arith.constant 0 : i32
    return %c0_i32, %arg1 : i32, i32
  }
  func.func @transform_3(%arg0: i32, %arg1: i32, %arg2: i32) -> (i32, i32) {
    %c0_i32 = arith.constant 0 : i32
    %c0_i32_0 = arith.constant 0 : i32
    return %c0_i32, %arg1 : i32, i32
  }
  func.func @transform_4(%arg0: i32, %arg1: i32, %arg2: i32) -> (i32, i32) {
    %c0_i32 = arith.constant 0 : i32
    %c0_i32_0 = arith.constant 0 : i32
    return %c0_i32, %arg1 : i32, i32
  }
  func.func @transform_5(%arg0: i32, %arg1: i32, %arg2: i32) -> (i32, i32) {
    %c0_i32 = arith.constant 0 : i32
    return %arg0, %arg1 : i32, i32
  }
}

</mosaic_0001>

<bundles_post_ra>
// kernel: tpu_custom_call.1
= control target key start
LH: loop header
LB: loop body
LE: loop exit
PB: predicated region body
PF: predicated region fallthrough
CT: control target
= control target key end

     0   :  { %10 = vsyncpa [#allocation4], 0  ;;  %s1138_s0 = inlined_call_operand.hbm [shape: f32[16,64], index: 0, kind: input, shape index: {}]   ;;  %s1139_s1 = inlined_call_operand.hbm [shape: bf16[64,64], index: 1, kind: input, shape index: {}]   ;;  %s1140_s2 = inlined_call_operand.vmem [shape: f32[1,64], index: 2, kind: input, shape index: {}]   ;;  %s1141_s3 = inlined_call_operand.vmem [shape: f32[1,64], index: 3, kind: input, shape index: {}]   ;;  %s1142_s4 = inlined_call_operand.vmem [shape: f32[1,64], index: 4, kind: input, shape index: {}]   ;;  %s1143_s5 = inlined_call_operand.hbm [shape: f32[16,64], index: 5, kind: output, shape index: {}]  }
   0x1   :  { %12 = vsyncpa [#allocation4 + $0x1], 0 }
   0x2   :  { %13 = vsyncpa [#allocation7], 0 }
   0x3   :  { %14 = vsyncpa [#allocation5], 0 }
   0x4   :  { %16 = vsyncpa [#allocation5 + $0x1], 0  ;;  %s907_s18 = smov 0   ;;  %s909_s19 = smov 0  }
   0x5   :  { %s911_s20 = smov 0   ;;  %s913_s21 = smov 0  }
   0x6   :  { %s915_s22 = smov 0   ;;  %s917_s23 = smov 0  }
   0x7 LB: > { %s600_s24 = sadd.s32 4294967295, %s868_s23   ;;  %s601_s25 = sadd.s32 4294967294, %s868_s23   ;;  %s868_s23 = sphi %s917_s23, %s22_s23   ;;  %s864_s22 = sphi %s915_s22, %s1167_s22   ;;  %s860_s21 = sphi %s913_s21, %s1166_s21   ;;  %s856_s20 = sphi %s911_s20, %s1165_s20   ;;  %s852_s19 = sphi %s909_s19, %s1164_s19   ;;  %s848_s18 = sphi %s907_s18, %s1163_s18  }
   0x8   : > { %p63_p0 = scmp.ne.s32.totalorder %s852_s19, %s848_s18  ;;  %p941_p1 = scmp.eq.s32.totalorder %s600_s24, 0 }
   0x9   : > { %p945_p2 = scmp.eq.s32.totalorder %s600_s24, 1  ;;  %p201_p3 = scmp.eq.s32.totalorder %s601_s25, 1 }
   0xa   : > { %s1148_s26 = scalar_select %p941_p1, 1, 0 }
   0xb   : > { %s1149_s27 = scalar_select %p945_p2, 1, 0 }
   0xc   : > { %p951_p4 = por %p941_p1, %p63_p0  ;;  %p602_p5 = scmp.ge.s32.totalorder %s868_s23, 1 }
   0xd   : > { %p956_p6 = por %p201_p3, %p63_p0  ;;  %p208_p7 = scmp.lt.s32.totalorder %s868_s23, 3 }
   0xe   : > { %s1150_s28 = scalar_select %p951_p4, 1, 0 }
   0xf   : > { %s1151_s29 = scalar_select %p956_p6, 1, 0 }
  0x10   : > { %p961_p8 = pnand %p602_p5, %p208_p7  ;;  %s870_s6 = smov [#allocation6]  }
  0x11   : > { %s224_s7 = sshll.u32 %s870_s6, 4  ;;  %s41_s9 = sadd.s32 1, %s864_s22  ;;  %s225_s7 = int_to_ptr.vmem [resolvable:$true] %s224_s7 }
  0x12   : > { %s1152_s30 = scalar_select %p961_p8, 1, 0 }
  0x13   : > { %p651_p9 = pneg %p961_p8  ;;  %s724_s12 = scalar_lea.hbm %s1139_s1, 512 }
  0x14   : > { %p725_p12 = scmp.ne.s32.totalorder %s1139_s1, %s724_s12  ;;  %p731_p5 = scmp.lt.u32.totalorder %s724_s12, %s1139_s1 }
  0x15   : > { %p970_p11 = pnand %p651_p9, %p941_p1 }
  0x17   : > { %p726_p13 = pneg %p970_p11 }
  0x19   : > { %p727_p0 = pnand %p726_p13, %p725_p12 }
  0x1b   : > { %p728_p3 = pneg %p727_p0 }
  0x1d   : > { %p733_p7 = pnand %p731_p5, %p728_p3 }
  0x1f   : > { %736 = shalt.err (!%p733_p7)
}
  0x20   : > { %s737_s17 = scalar_lea.vmem %s225_s7, 512  ;;  %p745_p1 = scmp.lt.s32.totalorder %s225_s7, %s225_s7 }
  0x21   : > { %p738_p9 = scmp.ne.s32.totalorder %s225_s7, %s737_s17  ;;  %p746_p4 = scmp.lt.s32.totalorder %s737_s17, %s737_s17 }
  0x23   : > { %p740_p10 = pnand %p738_p9, %p726_p13  ;;  %p747_p8 = por %p746_p4, %p745_p1 }
  0x25   : > { %p741_p6 = pneg %p740_p10 }
  0x27   : > { %p748_p2 = pnand %p747_p8, %p741_p6 }
  0x29   : > { %751 = shalt.err (!%p748_p2)
}
  0x2a   : > { %s871_s24 = smov 64   ;;  %s872_s25 = smov 4  }
  0x2b   : > { %654 = dma.hbm_to_vmem [thread:$0]  (!%p970_p11), %s1139_s1, 512, %s225_s7, [#allocation7], %s871_s24, %s871_s24, %s872_s25  }
  0x2c   : > { %p43_p1 = scmp.ge.s32.totalorder %s41_s9, 2  ;;  %s50_s11 = sadd.s32 1, %s856_s20 }
  0x2d   : > { %p57_p2 = scmp.ne.s32.totalorder %s856_s20, %s852_s19  ;;  %p58_p4 = scmp.eq.s32.totalorder %s868_s23, 0 }
  0x2e   : > { %s1169_s9 = smov (%p43_p1, %s41_s9), 0  ;;  %p1155_p8 = scmp.ne.s32.totalorder %s1149_s27, 0 }
  0x2f   : > { %p997_p6 = por %p58_p4, %p57_p2  ;;  %s45_s8 = ssub.s32 %s864_s22, %s1169_s9 }
  0x30   : > { %p1003_p10 = por %p1155_p8, %p57_p2  ;;  %p664_p12 = scmp.lt.s32.totalorder %s868_s23, 2 }
  0x31   : > { %p48_p11 = scmp.eq.s32.totalorder %s45_s8, 0  ;;  %s256_s7 = sand.u32 1, %s856_s20  }
  0x32   : > { %s608_s14 = sshll.u32 %s256_s7, 3  ;;  %s609_s16 = sshll.u32 %s864_s22, 7 }
  0x33   : > { %s1012_s15 = scalar_select %p48_p11, %s856_s20, %s50_s11  }
  0x34   : > { %s1018_s25 = scalar_lea.hbm %s1138_s0, %s609_s16  ;;  %s260_s27 = scalar_lea.vmem [#allocation3], %s608_s14 }
  0x35   : > { %s268_s6 = sshll.u32 %s260_s27, 4  ;;  %p1024_p13 = pnand %p664_p12, %p997_p6  ;;  %s1020_s6 = int_to_ptr.vmem [resolvable:$true] %s268_s6 }
  0x36   : > { %s257_s11 = scalar_lea.sflag [#allocation4], %s256_s7  ;;  %s752_s8 = scalar_lea.hbm %s1018_s25, 128 }
  0x37   : > { %p753_p0 = scmp.ne.s32.totalorder %s1018_s25, %s752_s8  ;;  %p754_p3 = pneg %p1024_p13 }
  0x38   : > { %s757_s17 = scalar_lea.hbm %s1138_s0, 256  ;;  %p758_p9 = scmp.lt.u32.totalorder %s1018_s25, %s1138_s0 }
  0x39   : > { %p755_p5 = pnand %p754_p3, %p753_p0  ;;  %p759_p1 = scmp.lt.u32.totalorder %s757_s17, %s752_s8 }
  0x3a   : > { %p761_p4 = scmp.lt.u32.totalorder %s752_s8, %s1018_s25 }
  0x3b   : > { %p756_p7 = pneg %p755_p5  ;;  %p760_p2 = por %p759_p1, %p758_p9 }
  0x3d   : > { %p762_p6 = por %p761_p4, %p760_p2 }
  0x3f   : > { %p763_p8 = pnand %p762_p6, %p756_p7 }
  0x41   : > { %766 = shalt.err (!%p763_p8)
}
  0x42   : > { %s767_s7 = scalar_lea.vmem %s1020_s6, 128  ;;  %s873_s27 = smov [#allocation3]  }
  0x43   : > { %p768_p12 = scmp.ne.s32.totalorder %s1020_s6, %s767_s7  ;;  %s772_s14 = sshll.u32 %s873_s27, 4  ;;  %s773_s14 = int_to_ptr.vmem [resolvable:$false] %s772_s14 }
  0x44   : > { %s774_s16 = scalar_lea.vmem %s773_s14, 256  ;;  %p775_p5 = scmp.lt.s32.totalorder %s1020_s6, %s773_s14 }
  0x45   : > { %p770_p11 = pnand %p768_p12, %p754_p3  ;;  %p776_p9 = scmp.lt.s32.totalorder %s774_s16, %s767_s7 }
  0x47   : > { %p771_p0 = pneg %p770_p11  ;;  %p777_p1 = por %p776_p9, %p775_p5 }
  0x49   : > { %p778_p2 = pnand %p777_p1, %p771_p0 }
  0x4b   : > { %781 = shalt.err (!%p778_p2)
}
  0x4c   : > { %658 = dma.hbm_to_vmem [thread:$0]  (!%p1024_p13), %s1018_s25, 128, %s1020_s6, %s257_s11  }
  0x4d   : > { %p1158_p7 = scmp.ne.s32.totalorder %s1152_s30, 0 }
  0x4e   : > { %s1056_s8 = sand.u32 (!%p1158_p7), 1, %s852_s19   ;;  %p1159_p3 = scmp.ne.s32.totalorder (!%p1158_p7), %s1150_s28, 0 }
  0x4f   : > { %277 = sbr.rel (%p1158_p7) target bundleno = 350 (0x15e), region = 40  ;;  %s611_s17 = sshll.u32 (!%p1158_p7), %s1056_s8, 3 }
  0x50   : > { %s280_s12 = scalar_lea.sflag (!%p1158_p7), [#allocation4], %s1056_s8  ;;  %s283_s24 = scalar_lea.vmem (!%p1158_p7), [#allocation3], %s611_s17 }
  0x56   : > { %835 = dma.done.wait (%p1159_p3), %s280_s12, 128  }
  0x57   : > { %837 = vsyncadd (%p1159_p3), %s280_s12, 4294967168  ;;  %p1160_p13 = scmp.ne.s32.totalorder %s1148_s26, 0 }
  0x59   : > { %839 = dma.done.wait (%p1160_p13), [#allocation7], 512  }
  0x5a   : > { %841 = vsyncadd (%p1160_p13), [#allocation7], 4294966784  ;;  %vm338_vm0 = vcmask 523264   ;;  %v874_v0 = vmov 0.0   ;;  %vm875_vm1 = vmmov 0   ;;  %v720_v1 = vld [vmem:[#allocation6] sm:$0xff]  }
  0x5b   : > { %631 = vmatprep.subr.bf16.mxu0 %v874_v0  ;;  %639 = vmatprep.mubr.msk.bf16.mxu0 %vm875_vm1, %v874_v0  ;;  %339 = vst.msk [vmem:[#allocation2] sm:$0xff] %vm338_vm0, %v874_v0  ;;  %v721_v2 = vld [vmem:[#allocation6 + $0x8] sm:$0xff]   ;;  %v722_v3 = vld [vmem:[#allocation6 + $0x10] sm:$0xff]   ;;  %v723_v4 = vld [vmem:[#allocation6 + $0x18] sm:$0xff]   ;;  %s623_s11 = sshll.u32 %s860_s21, 7  ;;  %s322_s7 = scalar_lea.vmem [#allocation8], %s611_s17 }
  0x5c   : > { %632 = vmatpush3.bf16.msra.mxu0 %v720_v1  ;;  %v341_v5 = vld [vmem:[%s283_s24] sm:$0xff]  ;;  %v619_v13 = vld [vmem:[%s1140_s2] ss:$0 sm:$0xff]  ;;  %s467_s27 = sshll.u32 %s322_s7, 4  ;;  %s1088_s12 = scalar_lea.hbm %s1143_s5, %s623_s11  ;;  %s1090_s27 = int_to_ptr.vmem [resolvable:$true] %s467_s27 }
  0x5d   : > { %633 = vmatprep.subr.bf16.mxu0 %v874_v0  ;;  %v342_v6 = vpack.c.bf16 %v341_v5, %v341_v5  ;;  %v620_v15 = vld [vmem:[%s1141_s3] ss:$0 sm:$0xff]  ;;  %s453_s24 = scalar_lea.sflag [#allocation5], %s1056_s8  ;;  %s782_s21 = scalar_lea.vmem %s1090_s27, 128 }
  0x5e   : > { %v621_v17 = vld [vmem:[%s1142_s4] ss:$0 sm:$0xff]  ;;  %p783_p4 = scmp.ne.s32.totalorder %s1090_s27, %s782_s21  ;;  %s876_s17 = smov [#allocation8]  }
  0x5f   : > { %s786_s26 = sshll.u32 %s876_s17, 4  ;;  %s787_s26 = int_to_ptr.vmem [resolvable:$false] %s786_s26 }
  0x60   : > { %634 = vmatpush3.bf16.msra.mxu0 %v721_v2  ;;  %p784_p6 = pnand %p783_p4, %p1003_p10  ;;  %s788_s28 = scalar_lea.vmem %s787_s26, 256 }
  0x61   : > { %635 = vmatprep.subr.bf16.mxu0 %v874_v0  ;;  %p789_p12 = scmp.lt.s32.totalorder %s1090_s27, %s787_s26  ;;  %p790_p11 = scmp.lt.s32.totalorder %s788_s28, %s782_s21 }
  0x62   : > { %v340_v7 = vld [vmem:[#allocation2] sm:$0xff]  ;;  %p785_p8 = pneg %p784_p6 }
  0x63   : > { %p791_p0 = por %p790_p11, %p789_p12 }
  0x64   : > { %636 = vmatpush3.bf16.msra.mxu0 %v722_v3 }
  0x65   : > { %637 = vmatprep.subr.bf16.mxu0 %v874_v0  ;;  %p792_p5 = pnand %p791_p0, %p785_p8 }
  0x68   : > { %638 = vmatpush3.bf16.msra.mxu0 %v723_v4 }
  0x6b   : > { %640 = vmatmul.mubr.msk.bf16.vlgmr.msra.gmra.mrb[0].mxu0 %vm338_vm0, %v342_v6 }
 0x13e   : > { %v413_v8 = vpop.f32.mrb[0].mxu0 }
 0x13f   : > { %v419_v9 = vadd.f32 %v413_v8, %v340_v7  ;;  %v641_v10 = vpop.f32.mrb[1].mxu0 }
 0x140   : > { %v416_v11 = vpop.f32.mrb[2].mxu0 }
 0x141   : > { %420 = vst.msk [vmem:[#allocation2] sm:$0xff] %vm338_vm0, %v419_v9  ;;  %v642_v12 = vpop.f32.mrb[3].mxu0 }
 0x148   : > { %v424_v14 = vld [vmem:[#allocation2] sm:$0xff] }
 0x149   : > { %v432_v16 = vmul.f32 %v619_v13, %v424_v14 }
 0x14b   : > { %v440_v18 = vadd.f32 %v620_v15, %v432_v16 }
 0x14d   : > { %vm441_vm2 = vcmp.ge.f32.partialorder %v440_v18, 0.0  ;;  %v449_v19 = vmul.f32 %v621_v17, %v440_v18 }
 0x14f   : > { %v450_v20 = vsel %vm441_vm2, %v440_v18, %v449_v19 }
 0x150   : > { %451 = vst.msk [vmem:[%s322_s7] sm:$0xff] %vm338_vm0, %v450_v20 }
 0x151   : > { %795 = shalt.err (!%p792_p5)
}
 0x152   : > { %s796_s8 = scalar_lea.hbm %s1088_s12, 128  ;;  %s800_s6 = scalar_lea.hbm %s1143_s5, 256 }
 0x153   : > { %p797_p9 = scmp.ne.s32.totalorder %s1088_s12, %s796_s8  ;;  %p801_p7 = scmp.lt.u32.totalorder %s1088_s12, %s1143_s5 }
 0x154   : > { %p802_p3 = scmp.lt.u32.totalorder %s800_s6, %s796_s8  ;;  %p804_p4 = scmp.lt.u32.totalorder %s796_s8, %s1088_s12 }
 0x155   : > { %p798_p1 = pnand %p797_p9, %p1003_p10 }
 0x156   : > { %p803_p13 = por %p802_p3, %p801_p7 }
 0x157   : > { %p799_p2 = pneg %p798_p1 }
 0x158   : > { %p805_p6 = por %p804_p4, %p803_p13 }
 0x15a   : > { %p806_p8 = pnand %p805_p6, %p799_p2 }
 0x15c   : > { %809 = shalt.err (!%p806_p8)
}
 0x15d   : > { %649 = dma.vmem_to_hbm [thread:$0]  (%p1003_p10), %s1090_s27, 128, %s1088_s12, %s453_s24  }
 0x15e PF: > { %s479_s7 = sand.u32 1, %s848_s18   ;;  %p1161_p12 = scmp.ne.s32.totalorder %s1151_s29, 0 }
 0x15f   : > { %p1162_p11 = scmp.ge.s32.totalorder %s868_s23, 2  ;;  %s480_s14 = scalar_lea.sflag [#allocation5], %s479_s7 }
 0x161   : > { %p660_p0 = pnand %p1162_p11, %p1161_p12 }
 0x163   : > { %843 = dma.done.wait (!%p660_p0), %s480_s14, 128  }
 0x164   : > { %845 = vsyncadd (!%p660_p0), %s480_s14, 4294967168  ;;  %s22_s23 = sadd.s32 1, %s868_s23   ;;  %s1163_s18 = smov %s852_s19 }
 0x165   : > { %p19_p5 = scmp.ge.s32.totalorder %s22_s23, 4   ;;  %s1164_s19 = smov %s856_s20 }
 0x166   : > { %s1165_s20 = smov %s1012_s15  ;;  %s1166_s21 = smov %s864_s22 }
 0x167   : > { %s1167_s22 = smov %s1169_s9  ;;  %21 = sbr.rel (!%p19_p5) target bundleno = 7 (0x7), region = 107 }
 0x16e   :  { %485 = vsyncpa [#allocation4], 1 }
 0x16f   :  { %487 = vsyncpa [#allocation4 + $0x1], 1 }
 0x170   :  { %488 = vsyncpa [#allocation7], 1 }
 0x171   :  { %489 = vsyncpa [#allocation5], 1 }
 0x172   :  { %491 = vsyncpa [#allocation5 + $0x1], 1 }

</bundles_post_ra>
